<compile_context>
chip_gen: v6e
topology: v6e:2x2x1
jax: 0.10.0
libtpu: 0.0.40
codegen_flags: <defaults>
</compile_context>

<pallas_src>
import functools

import jax
import jax.numpy as jnp
from jax import lax
from jax.experimental import pallas as pl
from jax.experimental.pallas import tpu as pltpu


def _device_kind():
    try:
        return jax.devices()[0].device_kind.lower()
    except Exception:
        return ""


def _default_tile_bytes():
    kind = _device_kind()
    if "v7" in kind:
        return 8 * 2**20            # ~3.2 TB/s HBM: big tiles hide 0.35us/step
    if "v5e" in kind or "v5 lite" in kind or "v5lite" in kind:
        return 2 * 2**20            # 16 MiB default scoped VMEM; 2 MiB saturates
    return 4 * 2**20                # v6e / default


def _default_num_cores():
    kind = _device_kind()
    if ("v7" in kind) or ("v4" in kind) or ("v5p" in kind):
        return 2                    # dual-TensorCore chips
    return 1


def _single_tile_kernel(goal_ref, traj_ref, out_ref, *, t_rows, group, scale):
    """Whole trajectory in one VMEM block; writes the final (1,1) scalar."""
    d_cols = goal_ref.shape[1]
    goal = goal_ref[...].astype(jnp.float32)                     # (1, D)

    n_full = t_rows // group
    tail = t_rows - n_full * group

    acc = jnp.zeros((group, d_cols), jnp.float32)

    def body(g, carry):
        off = pl.multiple_of(g * group, group)
        diff = traj_ref[pl.ds(off, group), :].astype(jnp.float32) - goal
        return carry + diff * diff

    if n_full > 0:
        unroll = n_full if n_full <= 16 else 8
        acc = lax.fori_loop(0, n_full, body, acc, unroll=unroll)

    total = jnp.sum(acc)
    if tail:
        # Static-shaped tail slice (tail < group rows): no padding, no garbage.
        diff = traj_ref[pl.ds(n_full * group, tail), :].astype(jnp.float32) - goal
        total = total + jnp.sum(diff * diff)

    out_ref[...] = jnp.reshape(total * scale, (1, 1))


def _partial_sum_kernel(goal_ref, traj_ref, out_ref, *,
                        t_rows, tile_rows, tiles_per_core, group):
    """Streams row tiles; accumulates per-core partial sums into out_ref."""
    c = pl.program_id(0)
    i = pl.program_id(1)

    @pl.when(i == 0)
    def _():
        out_ref[...] = jnp.zeros_like(out_ref)

    d_cols = goal_ref.shape[1]
    goal = goal_ref[...].astype(jnp.float32)                     # (1, D)

    # Logical (unclamped) first row of this tile; rows >= t_rows are masked.
    row0 = (c * tiles_per_core + i) * tile_rows
    rows_left = t_rows - row0                  # may be <= 0 or > tile_rows

    sub_iota = lax.broadcasted_iota(jnp.int32, (group, d_cols), 0)

    def body(g, carry):
        off = pl.multiple_of(g * group, group)
        diff = traj_ref[pl.ds(off, group), :].astype(jnp.float32) - goal
        sq = diff * diff
        valid = sub_iota < (rows_left - off)   # all-true for interior tiles
        return carry + jnp.where(valid, sq, 0.0)

    n_groups = tile_rows // group
    unroll = n_groups if n_groups <= 16 else 8
    part = lax.fori_loop(0, n_groups, body,
                         jnp.zeros((group, d_cols), jnp.float32),
                         unroll=unroll)
    out_ref[...] += part.reshape(1, group, d_cols)


def dense_goal_cost(goal_state, trajectory, *, max_tile_bytes=None, num_cores=None):
    """Pallas implementation of DenseGoalCost.forward(goal_state, trajectory)."""
    assert trajectory.ndim == 2, "expected trajectory of shape [T, dof]"
    t_rows, d_cols = trajectory.shape
    assert goal_state.shape == (d_cols,)

    itemsize = jnp.dtype(trajectory.dtype).itemsize
    group = 8 if itemsize >= 4 else (16 if itemsize == 2 else 32)

    scale = 10000.0 / float(t_rows * d_cols)     # fold 100**2 and the mean
    goal2d = goal_state.reshape(1, d_cols)

    # Generation-scaled row tile (keep DMA per grid step >> 0.35us overhead).
    tile_bytes = _default_tile_bytes() if max_tile_bytes is None else max_tile_bytes
    lane_padded = -(-d_cols // 128) * 128        # minor dim pads to 128 lanes
    bytes_per_row = lane_padded * itemsize
    tile_rows = max(group, (tile_bytes // bytes_per_row) // group * group)

    if t_rows <= tile_rows:
        # Single block: finish everything in-kernel, output is the scalar.
        kernel = functools.partial(_single_tile_kernel,
                                   t_rows=t_rows, group=group, scale=scale)
        out = pl.pallas_call(
            kernel,
            out_shape=jax.ShapeDtypeStruct((1, 1), jnp.float32),
            grid=(1,),
            in_specs=[
                pl.BlockSpec((1, d_cols), lambda i: (0, 0)),
                pl.BlockSpec((t_rows, d_cols), lambda i: (0, 0)),
            ],
            out_specs=pl.BlockSpec((1, 1), lambda i: (0, 0)),
            compiler_params=pltpu.CompilerParams(
                dimension_semantics=("arbitrary",)),
        )(goal2d, trajectory)
        return out[0, 0]

    # Multi-tile path: leading "parallel" axis splits the row stream across
    # TensorCores; each core owns one (1, group, D) partial-accumulator block.
    n_cores = _default_num_cores() if num_cores is None else num_cores
    tiles_total = -(-t_rows // tile_rows)
    n_cores = max(1, min(n_cores, tiles_total))
    tiles_per_core = -(-tiles_total // n_cores)

    def traj_index_map(c, i):
        # Clamp so fully-out-of-range tiles (ragged split across cores) re-read
        # a valid block; their rows are masked to zero inside the kernel.
        return (jnp.minimum(c * tiles_per_core + i, tiles_total - 1), 0)

    kernel = functools.partial(_partial_sum_kernel,
                               t_rows=t_rows, tile_rows=tile_rows,
                               tiles_per_core=tiles_per_core, group=group)
    partials = pl.pallas_call(
        kernel,
        out_shape=jax.ShapeDtypeStruct((n_cores, group, d_cols), jnp.float32),
        grid=(n_cores, tiles_per_core),
        in_specs=[
            pl.BlockSpec((1, d_cols), lambda c, i: (0, 0)),
            # TODO(synk): if DMA is still exposed on v7x, try
            # pipeline_mode=pl.Buffered(3) on this trajectory BlockSpec.
            pl.BlockSpec((tile_rows, d_cols), traj_index_map),
        ],
        out_specs=pl.BlockSpec((1, group, d_cols), lambda c, i: (c, 0, 0)),
        compiler_params=pltpu.CompilerParams(
            dimension_semantics=("parallel", "arbitrary")),
    )(goal2d, trajectory)

    # Tiny epilogue: reduce the few per-core partials + the folded scale.
    return jnp.sum(partials) * scale


if __name__ == "__main__":
    key = jax.random.PRNGKey(0)
    k_goal, k_traj, k_goal2, k_traj2 = jax.random.split(key, 4)

    # Advertised small case: trajectory [T=64, dof=8], goal_state [dof=8].
    T, D = 64, 8
    goal_state = jax.random.normal(k_goal, (D,), dtype=jnp.float32)
    trajectory = jax.random.normal(k_traj, (T, D), dtype=jnp.float32)
    cost = jax.block_until_ready(dense_goal_cost(goal_state, trajectory))
    ref = jnp.mean((100.0 * (trajectory - goal_state[None, :])) ** 2)
    assert jnp.allclose(cost, ref, rtol=1e-4, atol=1e-2), (cost, ref)

    # Larger case exercising the multi-tile / multi-core streaming path
    # (small tile override keeps the test quick and deterministic; T2 is not a
    # multiple of the tile so in-kernel tail masking is exercised too).
    T2 = 4104
    goal2 = jax.random.normal(k_goal2, (D,), dtype=jnp.float32)
    traj2 = jax.random.normal(k_traj2, (T2, D), dtype=jnp.float32)
    cost2 = jax.block_until_ready(
        dense_goal_cost(goal2, traj2, max_tile_bytes=64 * 1024, num_cores=2))
    ref2 = jnp.mean((100.0 * (traj2 - goal2[None, :])) ** 2)
    assert jnp.allclose(cost2, ref2, rtol=1e-4, atol=1e-2), (cost2, ref2)

    print("KERNEL_OK")
</pallas_src>

<mosaic_0001>
module attributes {stable_mosaic.version = 11 : i64} {
  func.func @_single_tile_kernel(%arg0: i32, %arg1: memref<1x8xf32, #tpu.memory_space<vmem>>, %arg2: memref<64x8xf32, #tpu.memory_space<vmem>>, %arg3: memref<1x1xf32, #tpu.memory_space<vmem>>) attributes {dimension_semantics = [#tpu.dimension_semantics<arbitrary>], iteration_bounds = array<i64: 1>, scalar_prefetch = 0 : i64, scratch_operands = 0 : i64, tpu.core_type = #tpu.core_type<tc>, window_params = [{pipeline_mode = #tpu.pipeline_mode<synchronous>, transform_indices = @transform_0, window_bounds = array<i64: 1, 8>}, {pipeline_mode = #tpu.pipeline_mode<synchronous>, transform_indices = @transform_1, window_bounds = array<i64: 64, 8>}, {pipeline_mode = #tpu.pipeline_mode<synchronous>, transform_indices = @transform_2, window_bounds = array<i64: 1, 1>}]} {
    %c0 = arith.constant 0 : index
    %c0_0 = arith.constant 0 : index
    %0 = vector.load %arg1[%c0, %c0_0] : memref<1x8xf32, #tpu.memory_space<vmem>>, vector<1x8xf32>
    %cst = arith.constant 0.000000e+00 : f32
    %1 = vector.broadcast %cst : f32 to vector<8x8xf32>
    %c0_i32 = arith.constant 0 : i32
    %c8_i32 = arith.constant 8 : i32
    %2 = arith.muli %c0_i32, %c8_i32 : i32
    %3 = tpu.assume_multiple %2, 8 : i32
    %4 = arith.index_cast %3 : i32 to index
    %c0_1 = arith.constant 0 : index
    %5 = vector.load %arg2[%4, %c0_1] : memref<64x8xf32, #tpu.memory_space<vmem>>, vector<8x8xf32>
    %6 = vector.broadcast %0 : vector<1x8xf32> to vector<8x8xf32>
    %7 = arith.subf %5, %6 : vector<8x8xf32>
    %8 = arith.mulf %7, %7 : vector<8x8xf32>
    %9 = arith.addf %1, %8 : vector<8x8xf32>
    %c1_i32 = arith.constant 1 : i32
    %c8_i32_2 = arith.constant 8 : i32
    %10 = arith.muli %c1_i32, %c8_i32_2 : i32
    %11 = tpu.assume_multiple %10, 8 : i32
    %12 = arith.index_cast %11 : i32 to index
    %c0_3 = arith.constant 0 : index
    %13 = vector.load %arg2[%12, %c0_3] : memref<64x8xf32, #tpu.memory_space<vmem>>, vector<8x8xf32>
    %14 = vector.broadcast %0 : vector<1x8xf32> to vector<8x8xf32>
    %15 = arith.subf %13, %14 : vector<8x8xf32>
    %16 = arith.mulf %15, %15 : vector<8x8xf32>
    %17 = arith.addf %9, %16 : vector<8x8xf32>
    %c2_i32 = arith.constant 2 : i32
    %c8_i32_4 = arith.constant 8 : i32
    %18 = arith.muli %c2_i32, %c8_i32_4 : i32
    %19 = tpu.assume_multiple %18, 8 : i32
    %20 = arith.index_cast %19 : i32 to index
    %c0_5 = arith.constant 0 : index
    %21 = vector.load %arg2[%20, %c0_5] : memref<64x8xf32, #tpu.memory_space<vmem>>, vector<8x8xf32>
    %22 = vector.broadcast %0 : vector<1x8xf32> to vector<8x8xf32>
    %23 = arith.subf %21, %22 : vector<8x8xf32>
    %24 = arith.mulf %23, %23 : vector<8x8xf32>
    %25 = arith.addf %17, %24 : vector<8x8xf32>
    %c3_i32 = arith.constant 3 : i32
    %c8_i32_6 = arith.constant 8 : i32
    %26 = arith.muli %c3_i32, %c8_i32_6 : i32
    %27 = tpu.assume_multiple %26, 8 : i32
    %28 = arith.index_cast %27 : i32 to index
    %c0_7 = arith.constant 0 : index
    %29 = vector.load %arg2[%28, %c0_7] : memref<64x8xf32, #tpu.memory_space<vmem>>, vector<8x8xf32>
    %30 = vector.broadcast %0 : vector<1x8xf32> to vector<8x8xf32>
    %31 = arith.subf %29, %30 : vector<8x8xf32>
    %32 = arith.mulf %31, %31 : vector<8x8xf32>
    %33 = arith.addf %25, %32 : vector<8x8xf32>
    %c4_i32 = arith.constant 4 : i32
    %c8_i32_8 = arith.constant 8 : i32
    %34 = arith.muli %c4_i32, %c8_i32_8 : i32
    %35 = tpu.assume_multiple %34, 8 : i32
    %36 = arith.index_cast %35 : i32 to index
    %c0_9 = arith.constant 0 : index
    %37 = vector.load %arg2[%36, %c0_9] : memref<64x8xf32, #tpu.memory_space<vmem>>, vector<8x8xf32>
    %38 = vector.broadcast %0 : vector<1x8xf32> to vector<8x8xf32>
    %39 = arith.subf %37, %38 : vector<8x8xf32>
    %40 = arith.mulf %39, %39 : vector<8x8xf32>
    %41 = arith.addf %33, %40 : vector<8x8xf32>
    %c5_i32 = arith.constant 5 : i32
    %c8_i32_10 = arith.constant 8 : i32
    %42 = arith.muli %c5_i32, %c8_i32_10 : i32
    %43 = tpu.assume_multiple %42, 8 : i32
    %44 = arith.index_cast %43 : i32 to index
    %c0_11 = arith.constant 0 : index
    %45 = vector.load %arg2[%44, %c0_11] : memref<64x8xf32, #tpu.memory_space<vmem>>, vector<8x8xf32>
    %46 = vector.broadcast %0 : vector<1x8xf32> to vector<8x8xf32>
    %47 = arith.subf %45, %46 : vector<8x8xf32>
    %48 = arith.mulf %47, %47 : vector<8x8xf32>
    %49 = arith.addf %41, %48 : vector<8x8xf32>
    %c6_i32 = arith.constant 6 : i32
    %c8_i32_12 = arith.constant 8 : i32
    %50 = arith.muli %c6_i32, %c8_i32_12 : i32
    %51 = tpu.assume_multiple %50, 8 : i32
    %52 = arith.index_cast %51 : i32 to index
    %c0_13 = arith.constant 0 : index
    %53 = vector.load %arg2[%52, %c0_13] : memref<64x8xf32, #tpu.memory_space<vmem>>, vector<8x8xf32>
    %54 = vector.broadcast %0 : vector<1x8xf32> to vector<8x8xf32>
    %55 = arith.subf %53, %54 : vector<8x8xf32>
    %56 = arith.mulf %55, %55 : vector<8x8xf32>
    %57 = arith.addf %49, %56 : vector<8x8xf32>
    %c7_i32 = arith.constant 7 : i32
    %c8_i32_14 = arith.constant 8 : i32
    %58 = arith.muli %c7_i32, %c8_i32_14 : i32
    %59 = tpu.assume_multiple %58, 8 : i32
    %60 = arith.index_cast %59 : i32 to index
    %c0_15 = arith.constant 0 : index
    %61 = vector.load %arg2[%60, %c0_15] : memref<64x8xf32, #tpu.memory_space<vmem>>, vector<8x8xf32>
    %62 = vector.broadcast %0 : vector<1x8xf32> to vector<8x8xf32>
    %63 = arith.subf %61, %62 : vector<8x8xf32>
    %64 = arith.mulf %63, %63 : vector<8x8xf32>
    %65 = arith.addf %57, %64 : vector<8x8xf32>
    %c8_i32_16 = arith.constant 8 : i32
    %66 = vector.shape_cast %65 : vector<8x8xf32> to vector<1x8x8xf32>
    %cst_17 = arith.constant dense<0.000000e+00> : vector<1xf32>
    %67 = vector.multi_reduction <add>, %66, %cst_17 [1, 2] : vector<1x8x8xf32> to vector<1xf32>
    %68 = vector.shape_cast %67 : vector<1xf32> to vector<1x1x1xf32>
    %69 = vector.extract %68[0, 0, 0] : f32 from vector<1x1x1xf32>
    %cst_18 = arith.constant 19.53125 : f32
    %70 = arith.mulf %69, %cst_18 : f32
    %71 = vector.broadcast %70 : f32 to vector<1x1xf32>
    %c0_19 = arith.constant 0 : index
    %c0_20 = arith.constant 0 : index
    %72 = vector.load %arg3[%c0_19, %c0_20] : memref<1x1xf32, #tpu.memory_space<vmem>>, vector<1x1xf32>
    tpu.vector_store %arg3[%c0_19, %c0_20], %71 {strides = array<i32>} : memref<1x1xf32, #tpu.memory_space<vmem>>, vector<1x1xf32>,
    return
  }
  func.func @transform_0(%arg0: i32) -> (i32, i32) {
    %c0_i32 = arith.constant 0 : i32
    %c0_i32_0 = arith.constant 0 : i32
    %c0_i32_1 = arith.constant 0 : i32
    return %c0_i32, %c0_i32_0 : i32, i32
  }
  func.func @transform_1(%arg0: i32) -> (i32, i32) {
    %c0_i32 = arith.constant 0 : i32
    %c0_i32_0 = arith.constant 0 : i32
    %c0_i32_1 = arith.constant 0 : i32
    return %c0_i32, %c0_i32_0 : i32, i32
  }
  func.func @transform_2(%arg0: i32) -> (i32, i32) {
    %c0_i32 = arith.constant 0 : i32
    %c0_i32_0 = arith.constant 0 : i32
    %c0_i32_1 = arith.constant 0 : i32
    return %c0_i32, %c0_i32_0 : i32, i32
  }
}

</mosaic_0001>

<bundles_post_ra>
// kernel: tpu_custom_call.1
= control target key start
LH: loop header
LB: loop body
LE: loop exit
PB: predicated region body
PF: predicated region fallthrough
CT: control target
= control target key end

     0   :  { %s166_s0 = inlined_call_operand.vmem [shape: f32[1,8], index: 0, kind: input, shape index: {}]   ;;  %s167_s1 = inlined_call_operand.vmem [shape: f32[64,8], index: 1, kind: input, shape index: {}]   ;;  %s168_s2 = inlined_call_operand.hbm [shape: f32[1,1], index: 2, kind: output, shape index: {}]  }
   0x1   :  { %v87_v0 = vld [vmem:[%s166_s0] ss:$0 sm:$0xff]  ;;  %v88_v2 = vld [vmem:[%s167_s1 + $0x8] sm:$0xff]  ;;  %v89_v5 = vld [vmem:[%s167_s1 + $0x10] sm:$0xff] }
   0x2   :  { %v13_v1 = vld [vmem:[%s167_s1] sm:$0xff]  ;;  %v25_v4 = vsub.f32 %v88_v2, %v87_v0  ;;  %v90_v6 = vld [vmem:[%s167_s1 + $0x18] sm:$0xff]  ;;  %v30_v8 = vsub.f32 %v89_v5, %v87_v0  ;;  %v92_v10 = vld [vmem:[%s167_s1 + $0x28] sm:$0xff] }
   0x3   :  { %v20_v3 = vsub.f32 %v13_v1, %v87_v0  ;;  %v91_v7 = vld [vmem:[%s167_s1 + $0x20] sm:$0xff]  ;;  %v35_v9 = vsub.f32 %v90_v6, %v87_v0 }
   0x4   :  { %v26_v12 = vmul.f32 %v25_v4, %v25_v4  ;;  %v40_v13 = vsub.f32 %v91_v7, %v87_v0 }
   0x5   :  { %v21_v11 = vmul.f32 %v20_v3, %v20_v3 }
   0x6   :  { %7 = vsyncpa [#allocation3], 0  ;;  %v31_v14 = vmul.f32 %v30_v8, %v30_v8  ;;  %v93_v15 = vld [vmem:[%s167_s1 + $0x30] sm:$0xff]  ;;  %v36_v17 = vmul.f32 %v35_v9, %v35_v9  ;;  %v45_v18 = vsub.f32 %v92_v10, %v87_v0  ;;  %v94_v19 = vld [vmem:[%s167_s1 + $0x38] sm:$0xff]  ;;  %v41_v21 = vmul.f32 %v40_v13, %v40_v13  ;;  %s120_s1 = smov [#allocation2]  }
   0x7   :  { %v27_v16 = vadd.f32 %v26_v12, %v21_v11  ;;  %v50_v22 = vsub.f32 %v93_v15, %v87_v0  ;;  %v55_v25 = vsub.f32 %v94_v19, %v87_v0  ;;  %vm58_vm0 = vcmask 64512   ;;  %s79_s26 = sshll.u32 %s120_s1, 4  ;;  %s80_s26 = int_to_ptr.vmem [resolvable:$true] %s79_s26 }
   0x8   :  { %v46_v24 = vmul.f32 %v45_v18, %v45_v18  ;;  %vm71_vm1 = vcmask 0   ;;  %s98_s29 = scalar_lea.vmem %s80_s26, 16  ;;  %s102_s30 = scalar_lea.vmem %s80_s26, 32 }
   0x9   :  { %v32_v20 = vadd.f32 %v31_v14, %v27_v16  ;;  %v51_v27 = vmul.f32 %v50_v22, %v50_v22  ;;  %v56_v29 = vmul.f32 %v55_v25, %v55_v25  ;;  %p99_p0 = scmp.ne.s32.totalorder %s80_s26, %s98_s29  ;;  %p103_p1 = scmp.lt.s32.totalorder %s80_s26, %s80_s26 }
   0xa   :  { %p104_p2 = scmp.lt.s32.totalorder %s102_s30, %s98_s29 }
   0xb   :  { %v37_v23 = vadd.f32 %v36_v17, %v32_v20 }
   0xc   :  { %p105_p3 = por %p104_p2, %p103_p1 }
   0xd   :  { %v42_v26 = vadd.f32 %v41_v21, %v37_v23 }
   0xe   :  { %p106_p4 = pnand %p105_p3, %p99_p0 }
   0xf   :  { %v47_v28 = vadd.f32 %v46_v24, %v42_v26 }
  0x11   :  { %v52_v30 = vadd.f32 %v51_v27, %v47_v28 }
  0x13   :  { %v57_v31 = vadd.f32 %v56_v29, %v52_v30 }
  0x15   :  { %v59_v32 = vsel %vm58_vm0, %v57_v31, 0.0 }
  0x16   :  { %60 = vadd.xlane.f32.xlu0 %v59_v32 }
  0x9f   :  { %v61_v33 = vpop.xlane.xlu0 %60 }
  0xa0   :  { %v62_v34 = vrot.slane %v61_v33, 4 }
  0xa2   :  { %v63_v35 = vadd.f32 %v62_v34, %v61_v33 }
  0xa4   :  { %v64_v36 = vrot.slane %v63_v35, 2 }
  0xa6   :  { %v65_v37 = vadd.f32 %v64_v36, %v63_v35 }
  0xa8   :  { %v66_v38 = vrot.slane %v65_v37, 1 }
  0xaa   :  { %v67_v39 = vadd.f32 %v66_v38, %v65_v37 }
  0xac   :  { %95 = vpush %v67_v39 }
  0xdd   :  { %s96_s27 = spop %95 }
  0xde   :  { %s69_s28 = smul.f32 19.53125, %s96_s27 }
  0xe0   :  { %v70_v40 = vstv %s69_s28 }
  0xe1   :  { %72 = vst.msk [vmem:[#allocation2] sm:$0x1] %vm71_vm1, %v70_v40 }
  0xe2   :  { %109 = shalt.err (!%p106_p4)
}
  0xe3   :  { %82 = dma.vmem_to_hbm [thread:$0]  %s80_s26, 16, %s168_s2, [#allocation3]  }
  0xe4   :  { %118 = dma.done.wait [#allocation3], 16  }
  0xe5   :  { %119 = vsyncadd [#allocation3], 4294967280 }
  0xe6   :  { %86 = vsyncpa [#allocation3], 1 }

</bundles_post_ra>
